<compile_context>
chip_gen: v7x
topology: tpu7x:2x2x1
jax: 0.10.0
libtpu: 0.0.40
codegen_flags: <defaults>
</compile_context>

<pallas_src>
import jax
import jax.numpy as jnp
from jax.experimental import pallas as pl
from jax.experimental.pallas import tpu as pltpu

# ----------------------------- small config ---------------------------------
BSZ = 2
SEQ = 8
DIM = 128          # lane-dense (multiple of 128)
HIDDEN_DIM = 256   # lane-dense (multiple of 128)


# ------------------------------- kernel --------------------------------------
def _ffn_kernel(x_ref, w1t_ref, w3t_ref, w2t_ref, o_ref, acc_ref):
    h_idx = pl.program_id(1)

    @pl.when(h_idx == 0)
    def _init():
        acc_ref[...] = jnp.zeros_like(acc_ref)

    x = x_ref[...]                                    # (tm, D)   bf16
    # Canonical (M,K)x(K,N) contractions; weights were transposed host-side.
    a = jnp.dot(x, w1t_ref[...],
                preferred_element_type=jnp.float32)   # (tm, th)  f32
    b = jnp.dot(x, w3t_ref[...],
                preferred_element_type=jnp.float32)   # (tm, th)  f32

    # SiLU(a) * b in f32: sigmoid rides the EUP slot, muls ride VPU slack.
    h = a * jax.nn.sigmoid(a) * b                     # (tm, th)  f32

    acc_ref[...] += jnp.dot(h.astype(w2t_ref.dtype), w2t_ref[...],
                            preferred_element_type=jnp.float32)   # (tm, D)

    @pl.when(h_idx == pl.num_programs(1) - 1)
    def _finalize():
        o_ref[...] = acc_ref[...].astype(o_ref.dtype)


# ----------------------------- tile helpers -----------------------------------
def _pick_tile(full, pref, align):
    """Largest tile <= pref that divides `full` and is a multiple of `align`;
    falls back to the full extent (always legal per the (8,128) rule)."""
    if full <= pref:
        return full
    t = (pref // align) * align
    while t > align and full % t != 0:
        t -= align
    return t if (t > 0 and full % t == 0) else full


# ------------------------------- wrapper --------------------------------------
def feed_forward(x, w1, w2, w3, *, row_tile=None, hidden_tile=None,
                 compute_dtype=jnp.bfloat16):
    """x: (B, S, D); w1/w3: (H, D); w2: (D, H)  (PyTorch nn.Linear layout).
    Returns (B, S, D) = w2(SiLU(w1 x) * w3 x), computed in bf16 on the MXU
    with f32 accumulation and f32 SiLU math."""
    B, S, D = x.shape
    H = w1.shape[0]
    M = B * S

    # Row tile: multiples of 256 when M is large (MXU-full, megacore-capable);
    # single step at decode-shaped M.  Hidden tile: stream weights in chunks
    # so VMEM stays in budget at production dims (v7x: 64 MiB).
    tm = row_tile if row_tile is not None else _pick_tile(M, 256, 8)
    th = hidden_tile if hidden_tile is not None else _pick_tile(H, 512, 128)
    assert M % tm == 0 and H % th == 0
    assert (tm % 8 == 0) or (tm == M)
    assert (th % 128 == 0) or (th == H)

    # One-time layout plumbing on the host: flatten rows, transpose weights,
    # cast operands to the MXU-native compute dtype.
    x2 = x.reshape(M, D).astype(compute_dtype)        # (M, D)
    w1t = w1.T.astype(compute_dtype)                  # (D, H)
    w3t = w3.T.astype(compute_dtype)                  # (D, H)
    w2t = w2.T.astype(compute_dtype)                  # (H, D)

    itemsize = jnp.dtype(compute_dtype).itemsize
    cost = pl.CostEstimate(
        flops=6 * M * D * H,                          # three matmuls
        transcendentals=M * H,                        # sigmoid
        bytes_accessed=(x2.size + w1t.size + w3t.size + w2t.size) * itemsize
        + M * D * jnp.dtype(x.dtype).itemsize)

    out2 = pl.pallas_call(
        _ffn_kernel,
        out_shape=jax.ShapeDtypeStruct((M, D), x.dtype),
        grid=(M // tm, H // th),                      # reduction (H) axis last
        in_specs=[
            pl.BlockSpec((tm, D), lambda i, h: (i, 0)),   # activations
            pl.BlockSpec((D, th), lambda i, h: (0, h)),   # w1^T  H-chunk
            pl.BlockSpec((D, th), lambda i, h: (0, h)),   # w3^T  H-chunk
            pl.BlockSpec((th, D), lambda i, h: (h, 0)),   # w2^T  H-chunk
        ],
        out_specs=pl.BlockSpec((tm, D), lambda i, h: (i, 0)),  # lane-dense
        scratch_shapes=[pltpu.VMEM((tm, D), jnp.float32)],     # f32 accumulator
        compiler_params=pltpu.CompilerParams(
            dimension_semantics=("parallel", "arbitrary")),
        cost_estimate=cost,
    )(x2, w1t, w3t, w2t)

    return out2.reshape(B, S, D)


# ------------------------------ reference -------------------------------------
def feed_forward_ref(x, w1, w2, w3):
    a = jnp.einsum("bsd,hd->bsh", x, w1)
    b = jnp.einsum("bsd,hd->bsh", x, w3)
    h = a * jax.nn.sigmoid(a) * b
    return jnp.einsum("bsh,dh->bsd", h, w2)


# --------------------------------- main ---------------------------------------
if __name__ == "__main__":
    key = jax.random.PRNGKey(0)
    kx, k1, k2, k3 = jax.random.split(key, 4)

    x = jax.random.normal(kx, (BSZ, SEQ, DIM), dtype=jnp.float32)
    w1 = (0.02 * jax.random.normal(k1, (HIDDEN_DIM, DIM))).astype(jnp.float32)
    w2 = (0.02 * jax.random.normal(k2, (DIM, HIDDEN_DIM))).astype(jnp.float32)
    w3 = (0.02 * jax.random.normal(k3, (HIDDEN_DIM, DIM))).astype(jnp.float32)

    y = feed_forward(x, w1, w2, w3)
    y = jax.block_until_ready(y)

    assert y.shape == (BSZ, SEQ, DIM)
    assert bool(jnp.all(jnp.isfinite(y)))

    y_ref = jax.block_until_ready(feed_forward_ref(x, w1, w2, w3))
    assert jnp.allclose(y, y_ref, rtol=2e-2, atol=2e-3), (
        float(jnp.max(jnp.abs(y - y_ref))))

    print("KERNEL_OK")
</pallas_src>

<mosaic_0001>
module attributes {stable_mosaic.version = 11 : i64} {
  func.func @_ffn_kernel(%arg0: i32, %arg1: i32, %arg2: memref<16x128xbf16, #tpu.memory_space<vmem>>, %arg3: memref<128x256xbf16, #tpu.memory_space<vmem>>, %arg4: memref<128x256xbf16, #tpu.memory_space<vmem>>, %arg5: memref<256x128xbf16, #tpu.memory_space<vmem>>, %arg6: memref<16x128xf32, #tpu.memory_space<vmem>>, %arg7: memref<16x128xf32, #tpu.memory_space<vmem>>) attributes {dimension_semantics = [#tpu.dimension_semantics<parallel>, #tpu.dimension_semantics<arbitrary>], iteration_bounds = array<i64: 1, 1>, scalar_prefetch = 0 : i64, scratch_operands = 1 : i64, tpu.core_type = #tpu.core_type<tc>, window_params = [{transform_indices = @transform_0, window_bounds = array<i64: 16, 128>}, {transform_indices = @transform_1, window_bounds = array<i64: 128, 256>}, {transform_indices = @transform_2, window_bounds = array<i64: 128, 256>}, {transform_indices = @transform_3, window_bounds = array<i64: 256, 128>}, {transform_indices = @transform_4, window_bounds = array<i64: 16, 128>}]} {
    %c0_i32 = arith.constant 0 : i32
    %0 = arith.cmpi eq, %arg1, %c0_i32 : i32
    %1 = arith.extui %0 : i1 to i32
    %c0_i32_0 = arith.constant 0 : i32
    %2 = arith.cmpi ne, %1, %c0_i32_0 : i32
    scf.if %2 {
      %cst_17 = arith.constant 0.000000e+00 : f32
      %24 = vector.broadcast %cst_17 : f32 to vector<16x128xf32>
      %c0_18 = arith.constant 0 : index
      %c0_19 = arith.constant 0 : index
      %25 = vector.load %arg7[%c0_18, %c0_19] : memref<16x128xf32, #tpu.memory_space<vmem>>, vector<16x128xf32>
      tpu.vector_store %arg7[%c0_18, %c0_19], %24 {strides = array<i32>} : memref<16x128xf32, #tpu.memory_space<vmem>>, vector<16x128xf32>,
    } else {
    }
    %c0 = arith.constant 0 : index
    %c0_1 = arith.constant 0 : index
    %3 = vector.load %arg2[%c0, %c0_1] : memref<16x128xbf16, #tpu.memory_space<vmem>>, vector<16x128xbf16>
    %c0_2 = arith.constant 0 : index
    %c0_3 = arith.constant 0 : index
    %4 = vector.load %arg3[%c0_2, %c0_3] : memref<128x256xbf16, #tpu.memory_space<vmem>>, vector<128x256xbf16>
    %cst = arith.constant dense<0.000000e+00> : vector<16x256xf32>
    %5 = tpu.matmul %3, %4, %cst {dimension_numbers = #tpu.dot_dimension_numbers<[1], [0], [0], [1], [0, 0, 1, 1], [], []>} : vector<16x128xbf16>, vector<128x256xbf16>, vector<16x256xf32> -> vector<16x256xf32>
    %c0_4 = arith.constant 0 : index
    %c0_5 = arith.constant 0 : index
    %6 = vector.load %arg4[%c0_4, %c0_5] : memref<128x256xbf16, #tpu.memory_space<vmem>>, vector<128x256xbf16>
    %cst_6 = arith.constant dense<0.000000e+00> : vector<16x256xf32>
    %7 = tpu.matmul %3, %6, %cst_6 {dimension_numbers = #tpu.dot_dimension_numbers<[1], [0], [0], [1], [0, 0, 1, 1], [], []>} : vector<16x128xbf16>, vector<128x256xbf16>, vector<16x256xf32> -> vector<16x256xf32>
    %8 = arith.negf %5 : vector<16x256xf32>
    %9 = math.exp %8 : vector<16x256xf32>
    %cst_7 = arith.constant 1.000000e+00 : f32
    %10 = vector.broadcast %cst_7 : f32 to vector<16x256xf32>
    %11 = arith.addf %10, %9 : vector<16x256xf32>
    %12 = arith.divf %10, %11 : vector<16x256xf32>
    %13 = arith.mulf %5, %12 : vector<16x256xf32>
    %14 = arith.mulf %13, %7 : vector<16x256xf32>
    %c0_8 = arith.constant 0 : index
    %c0_9 = arith.constant 0 : index
    %15 = vector.load %arg7[%c0_8, %c0_9] : memref<16x128xf32, #tpu.memory_space<vmem>>, vector<16x128xf32>
    %16 = arith.truncf %14 : vector<16x256xf32> to vector<16x256xbf16>
    %c0_10 = arith.constant 0 : index
    %c0_11 = arith.constant 0 : index
    %17 = vector.load %arg5[%c0_10, %c0_11] : memref<256x128xbf16, #tpu.memory_space<vmem>>, vector<256x128xbf16>
    %cst_12 = arith.constant dense<0.000000e+00> : vector<16x128xf32>
    %18 = tpu.matmul %16, %17, %cst_12 {dimension_numbers = #tpu.dot_dimension_numbers<[1], [0], [0], [1], [0, 0, 1, 1], [], []>} : vector<16x256xbf16>, vector<256x128xbf16>, vector<16x128xf32> -> vector<16x128xf32>
    %19 = arith.addf %15, %18 : vector<16x128xf32>
    %c0_13 = arith.constant 0 : index
    %c0_14 = arith.constant 0 : index
    %20 = vector.load %arg7[%c0_13, %c0_14] : memref<16x128xf32, #tpu.memory_space<vmem>>, vector<16x128xf32>
    tpu.vector_store %arg7[%c0_13, %c0_14], %19 {strides = array<i32>} : memref<16x128xf32, #tpu.memory_space<vmem>>, vector<16x128xf32>,
    %c0_i32_15 = arith.constant 0 : i32
    %21 = arith.cmpi eq, %arg1, %c0_i32_15 : i32
    %22 = arith.extui %21 : i1 to i32
    %c0_i32_16 = arith.constant 0 : i32
    %23 = arith.cmpi ne, %22, %c0_i32_16 : i32
    scf.if %23 {
      %c0_17 = arith.constant 0 : index
      %c0_18 = arith.constant 0 : index
      %24 = vector.load %arg7[%c0_17, %c0_18] : memref<16x128xf32, #tpu.memory_space<vmem>>, vector<16x128xf32>
      %c0_19 = arith.constant 0 : index
      %c0_20 = arith.constant 0 : index
      %25 = vector.load %arg6[%c0_19, %c0_20] : memref<16x128xf32, #tpu.memory_space<vmem>>, vector<16x128xf32>
      tpu.vector_store %arg6[%c0_19, %c0_20], %24 {strides = array<i32>} : memref<16x128xf32, #tpu.memory_space<vmem>>, vector<16x128xf32>,
    } else {
    }
    return
  }
  func.func @transform_0(%arg0: i32, %arg1: i32) -> (i32, i32) {
    %c0_i32 = arith.constant 0 : i32
    %c0_i32_0 = arith.constant 0 : i32
    return %arg0, %c0_i32 : i32, i32
  }
  func.func @transform_1(%arg0: i32, %arg1: i32) -> (i32, i32) {
    %c0_i32 = arith.constant 0 : i32
    %c0_i32_0 = arith.constant 0 : i32
    return %c0_i32, %arg1 : i32, i32
  }
  func.func @transform_2(%arg0: i32, %arg1: i32) -> (i32, i32) {
    %c0_i32 = arith.constant 0 : i32
    %c0_i32_0 = arith.constant 0 : i32
    return %c0_i32, %arg1 : i32, i32
  }
  func.func @transform_3(%arg0: i32, %arg1: i32) -> (i32, i32) {
    %c0_i32 = arith.constant 0 : i32
    %c0_i32_0 = arith.constant 0 : i32
    return %arg1, %c0_i32 : i32, i32
  }
  func.func @transform_4(%arg0: i32, %arg1: i32) -> (i32, i32) {
    %c0_i32 = arith.constant 0 : i32
    %c0_i32_0 = arith.constant 0 : i32
    return %arg0, %c0_i32 : i32, i32
  }
}

</mosaic_0001>

<bundles_post_ra>
// kernel: tpu_custom_call.1
= control target key start
LH: loop header
LB: loop body
LE: loop exit
PB: predicated region body
PF: predicated region fallthrough
CT: control target
= control target key end

     0   :  { %9 = vsyncpa [#allocation4], 0  ;;  %s1002_s0 = inlined_call_operand.hbm [shape: bf16[16,128], index: 0, kind: input, shape index: {}]   ;;  %s1003_s1 = inlined_call_operand.hbm [shape: bf16[128,256], index: 1, kind: input, shape index: {}]   ;;  %s1004_s2 = inlined_call_operand.hbm [shape: bf16[128,256], index: 2, kind: input, shape index: {}]   ;;  %s1005_s3 = inlined_call_operand.hbm [shape: bf16[256,128], index: 3, kind: input, shape index: {}]   ;;  %s1006_s4 = inlined_call_operand.hbm [shape: f32[16,128], index: 4, kind: output, shape index: {}]  }
   0x1   :  { %10 = vsyncpa [#allocation7], 0 }
   0x2   :  { %11 = vsyncpa [#allocation10], 0 }
   0x3   :  { %12 = vsyncpa [#allocation5], 0  ;;  %s885_s15 = smov [#allocation6]   ;;  %s767_s19 = scalar_lea.hbm %s1003_s1, 2048 }
   0x4   :  { %s30_s16 = sshll.u32 %s885_s15, 4  ;;  %p768_p0 = scmp.ne.s32.totalorder %s1003_s1, %s767_s19  ;;  %s31_s16 = int_to_ptr.vmem [resolvable:$true] %s30_s16 }
   0x5   :  { %p771_p1 = scmp.lt.u32.totalorder %s767_s19, %s1003_s1 }
   0x7   :  { %p773_p2 = pnand %p771_p1, %p768_p0 }
   0x9   :  { %776 = shalt.err (!%p773_p2)
}
   0xa   :  { %s777_s24 = scalar_lea.vmem %s31_s16, 2048  ;;  %p782_p4 = scmp.lt.s32.totalorder %s31_s16, %s31_s16 }
   0xb   :  { %p778_p3 = scmp.ne.s32.totalorder %s31_s16, %s777_s24  ;;  %p783_p5 = scmp.lt.s32.totalorder %s777_s24, %s777_s24 }
   0xd   :  { %p784_p6 = por %p783_p5, %p782_p4 }
   0xf   :  { %p785_p7 = pnand %p784_p6, %p778_p3 }
  0x11   :  { %788 = shalt.err (!%p785_p7)
}
  0x12   :  { %s886_s25 = smov 128   ;;  %s887_s26 = smov 8  }
  0x13   :  { %36 = dma.hbm_to_vmem [thread:$0]  %s1003_s1, 2048, %s31_s16, [#allocation7], %s886_s25, %s886_s25, %s887_s26  }
  0x14   :  { %s888_s29 = smov [#allocation3]   ;;  %s789_s7 = scalar_lea.hbm %s1002_s0, 128 }
  0x15   :  { %s18_s30 = sshll.u32 %s888_s29, 4  ;;  %p790_p8 = scmp.ne.s32.totalorder %s1002_s0, %s789_s7  ;;  %s19_s30 = int_to_ptr.vmem [resolvable:$true] %s18_s30 }
  0x16   :  { %p793_p9 = scmp.lt.u32.totalorder %s789_s7, %s1002_s0 }
  0x18   :  { %p795_p10 = pnand %p793_p9, %p790_p8 }
  0x1a   :  { %798 = shalt.err (!%p795_p10)
}
  0x1b   :  { %s799_s12 = scalar_lea.vmem %s19_s30, 128  ;;  %p804_p12 = scmp.lt.s32.totalorder %s19_s30, %s19_s30 }
  0x1c   :  { %p800_p11 = scmp.ne.s32.totalorder %s19_s30, %s799_s12  ;;  %p805_p13 = scmp.lt.s32.totalorder %s799_s12, %s799_s12 }
  0x1e   :  { %p806_p0 = por %p805_p13, %p804_p12 }
  0x20   :  { %p807_p1 = pnand %p806_p0, %p800_p11 }
  0x22   :  { %810 = shalt.err (!%p807_p1)
}
  0x23   :  { %s889_s1 = smov 64   ;;  %s890_s13 = smov 4  }
  0x24   :  { %24 = dma.hbm_to_vmem [thread:$0]  %s1002_s0, 128, %s19_s30, [#allocation4], %s889_s1, %s889_s1, %s890_s13  }
  0x25   :  { %s891_s16 = smov [#allocation8]   ;;  %s892_s18 = smov [#allocation9]  }
  0x26   :  { %s42_s17 = sshll.u32 %s891_s16, 4  ;;  %s54_s19 = sshll.u32 %s892_s18, 4  ;;  %s43_s17 = int_to_ptr.vmem [resolvable:$true] %s42_s17  ;;  %s950_s19 = int_to_ptr.vmem [resolvable:$true] %s54_s19 }
  0x27   :  { %s811_s22 = scalar_lea.hbm %s1004_s2, 2048 }
  0x28   :  { %p812_p2 = scmp.ne.s32.totalorder %s1004_s2, %s811_s22  ;;  %p815_p3 = scmp.lt.u32.totalorder %s811_s22, %s1004_s2 }
  0x2a   :  { %p817_p4 = pnand %p815_p3, %p812_p2 }
  0x2c   :  { %820 = shalt.err (!%p817_p4)
}
  0x2d   :  { %s821_s0 = scalar_lea.vmem %s43_s17, 2048  ;;  %p826_p6 = scmp.lt.s32.totalorder %s43_s17, %s43_s17 }
  0x2e   :  { %p822_p5 = scmp.ne.s32.totalorder %s43_s17, %s821_s0  ;;  %p827_p7 = scmp.lt.s32.totalorder %s821_s0, %s821_s0 }
  0x30   :  { %p828_p8 = por %p827_p7, %p826_p6 }
  0x32   :  { %p829_p9 = pnand %p828_p8, %p822_p5 }
  0x34   :  { %832 = shalt.err (!%p829_p9)
}
  0x35   :  { %48 = dma.hbm_to_vmem [thread:$0]  %s1004_s2, 2048, %s43_s17, [#allocation7], %s886_s25, %s886_s25, %s887_s26  }
  0x36   :  { %s833_s7 = scalar_lea.hbm %s1005_s3, 2048 }
  0x37   :  { %p834_p10 = scmp.ne.s32.totalorder %s1005_s3, %s833_s7  ;;  %p837_p11 = scmp.lt.u32.totalorder %s833_s7, %s1005_s3 }
  0x39   :  { %p839_p12 = pnand %p837_p11, %p834_p10 }
  0x3b   :  { %842 = shalt.err (!%p839_p12)
}
  0x3c   :  { %s843_s12 = scalar_lea.vmem %s950_s19, 2048  ;;  %p848_p0 = scmp.lt.s32.totalorder %s950_s19, %s950_s19 }
  0x3d   :  { %p844_p13 = scmp.ne.s32.totalorder %s950_s19, %s843_s12  ;;  %p849_p1 = scmp.lt.s32.totalorder %s843_s12, %s843_s12 }
  0x3f   :  { %p850_p2 = por %p849_p1, %p848_p0 }
  0x41   :  { %p851_p3 = pnand %p850_p2, %p844_p13 }
  0x43   :  { %854 = shalt.err (!%p851_p3)
}
  0x44   :  { %60 = dma.hbm_to_vmem [thread:$0]  %s1005_s3, 2048, %s950_s19, [#allocation10], %s889_s1, %s889_s1, %s890_s13  }
  0x45   :  { %877 = dma.done.wait [#allocation4], 128  }
  0x46   :  { %878 = vsyncadd [#allocation4], 4294967168 }
  0x47   :  { %879 = dma.done.wait [#allocation7], 4096  }
  0x48   :  { %880 = vsyncadd [#allocation7], 4294963200 }
  0x49   :  { %881 = dma.done.wait [#allocation10], 2048  }
  0x4a   :  { %882 = vsyncadd [#allocation10], 4294965248  ;;  %v893_v0 = vmov 0   ;;  %v686_v1 = vld [vmem:[#allocation6 + $0x4] ss:$8 sps:$4 sm:$0xff]   ;;  %v716_v29 = vld [vmem:[#allocation3] sm:$0xff]  }
  0x4b   :  { %216 = vmatprep.mubr.bf16.mxu0 %v893_v0  ;;  %355 = vmatprep.mubr.bf16.mxu1 %v893_v0  ;;  %v688_v2 = vld [vmem:[#allocation6] ss:$8 sps:$4 sm:$0xff]   ;;  %v689_v3 = vld [vmem:[#allocation6 + $0x14] ss:$8 sps:$4 sm:$0xff]   ;;  %v691_v4 = vld [vmem:[#allocation6 + $0x10] ss:$8 sps:$4 sm:$0xff]  }
  0x4c   :  { %184 = vmatprep.subr.bf16.mxu0 %v686_v1  ;;  %v692_v5 = vld [vmem:[#allocation6 + $0x24] ss:$8 sps:$4 sm:$0xff]   ;;  %v694_v6 = vld [vmem:[#allocation6 + $0x20] ss:$8 sps:$4 sm:$0xff]   ;;  %v695_v7 = vld [vmem:[#allocation6 + $0x34] ss:$8 sps:$4 sm:$0xff]  }
  0x4d   :  { %185 = vmatpush1.bf16.msra.mxu0 %v688_v2  ;;  %v707_v8 = vld [vmem:[#allocation8 + $0x4] ss:$8 sps:$4 sm:$0xff]   ;;  %v709_v9 = vld [vmem:[#allocation8] ss:$8 sps:$4 sm:$0xff]   ;;  %v697_v10 = vld [vmem:[#allocation6 + $0x30] ss:$8 sps:$4 sm:$0xff]  }
  0x4e   :  { %186 = vmatprep.subr.bf16.mxu0 %v689_v3  ;;  %v698_v11 = vld [vmem:[#allocation6 + $0x44] ss:$8 sps:$4 sm:$0xff]   ;;  %323 = vmatprep.subr.bf16.mxu1 %v707_v8  ;;  %v713_v12 = vld [vmem:[#allocation8 + $0x14] ss:$8 sps:$4 sm:$0xff]   ;;  %v715_v13 = vld [vmem:[#allocation8 + $0x10] ss:$8 sps:$4 sm:$0xff]  }
  0x4f   :  { %324 = vmatpush1.bf16.msra.mxu1 %v709_v9  ;;  %v700_v14 = vld [vmem:[#allocation6 + $0x40] ss:$8 sps:$4 sm:$0xff]   ;;  %v717_v15 = vld [vmem:[#allocation8 + $0x24] ss:$8 sps:$4 sm:$0xff]   ;;  %v701_v16 = vld [vmem:[#allocation6 + $0x54] ss:$8 sps:$4 sm:$0xff]  }
  0x50   :  { %325 = vmatprep.subr.bf16.mxu1 %v713_v12  ;;  %v719_v17 = vld [vmem:[#allocation8 + $0x20] ss:$8 sps:$4 sm:$0xff]   ;;  %v720_v18 = vld [vmem:[#allocation8 + $0x34] ss:$8 sps:$4 sm:$0xff]   ;;  %v703_v19 = vld [vmem:[#allocation6 + $0x50] ss:$8 sps:$4 sm:$0xff]  }
  0x51   :  { %187 = vmatpush1.bf16.msra.mxu0 %v691_v4  ;;  %v704_v20 = vld [vmem:[#allocation6 + $0x64] ss:$8 sps:$4 sm:$0xff]   ;;  %v706_v21 = vld [vmem:[#allocation6 + $0x60] ss:$8 sps:$4 sm:$0xff]   ;;  %v722_v22 = vld [vmem:[#allocation8 + $0x30] ss:$8 sps:$4 sm:$0xff]  }
  0x52   :  { %188 = vmatprep.subr.bf16.mxu0 %v692_v5  ;;  %v710_v23 = vld [vmem:[#allocation6 + $0x74] ss:$8 sps:$4 sm:$0xff]   ;;  %v723_v24 = vld [vmem:[#allocation8 + $0x44] ss:$8 sps:$4 sm:$0xff]   ;;  %v725_v25 = vld [vmem:[#allocation8 + $0x40] ss:$8 sps:$4 sm:$0xff]  }
  0x53   :  { %326 = vmatpush1.bf16.msra.mxu1 %v715_v13  ;;  %v726_v26 = vld [vmem:[#allocation8 + $0x54] ss:$8 sps:$4 sm:$0xff]   ;;  %v712_v27 = vld [vmem:[#allocation6 + $0x70] ss:$8 sps:$4 sm:$0xff]   ;;  %v729_v30 = vld [vmem:[#allocation8 + $0x64] ss:$8 sps:$4 sm:$0xff]  }
  0x54   :  { %327 = vmatprep.subr.bf16.mxu1 %v717_v15  ;;  %v728_v28 = vld [vmem:[#allocation8 + $0x50] ss:$8 sps:$4 sm:$0xff]   ;;  %v731_v31 = vld [vmem:[#allocation8 + $0x60] ss:$8 sps:$4 sm:$0xff]   ;;  %v732_v32 = vld [vmem:[#allocation8 + $0x74] ss:$8 sps:$4 sm:$0xff]  }
  0x55   :  { %189 = vmatpush1.bf16.msra.mxu0 %v694_v6  ;;  %v734_v33 = vld [vmem:[#allocation8 + $0x70] ss:$8 sps:$4 sm:$0xff]   ;;  %v735_v34 = vld [vmem:[#allocation9 + $0x40] sm:$0xff]   ;;  %v737_v36 = vld [vmem:[#allocation9 + $0x48] sm:$0xff]   ;;  %s894_s3 = smov [#allocation11]  }
  0x56   :  { %190 = vmatprep.subr.bf16.mxu0 %v695_v7  ;;  %v736_v35 = vld [vmem:[#allocation9] sm:$0xff]   ;;  %v738_v37 = vld [vmem:[#allocation9 + $0x8] sm:$0xff]   ;;  %v739_v38 = vld [vmem:[#allocation9 + $0x50] sm:$0xff]   ;;  %s587_s1 = sshll.u32 %s894_s3, 4  ;;  %s588_s1 = int_to_ptr.vmem [resolvable:$true] %s587_s1 }
  0x57   :  { %328 = vmatpush1.bf16.msra.mxu1 %v719_v17  ;;  %v740_v39 = vld [vmem:[#allocation9 + $0x10] sm:$0xff]   ;;  %v741_v40 = vld [vmem:[#allocation9 + $0x58] sm:$0xff]   ;;  %v743_v42 = vld [vmem:[#allocation9 + $0x60] sm:$0xff]   ;;  %s855_s13 = scalar_lea.vmem %s588_s1, 256  ;;  %p860_p5 = scmp.lt.s32.totalorder %s588_s1, %s588_s1 }
  0x58   :  { %329 = vmatprep.subr.bf16.mxu1 %v720_v18  ;;  %v742_v41 = vld [vmem:[#allocation9 + $0x18] sm:$0xff]   ;;  %v744_v43 = vld [vmem:[#allocation9 + $0x20] sm:$0xff]   ;;  %v745_v44 = vld [vmem:[#allocation9 + $0x68] sm:$0xff]   ;;  %p856_p4 = scmp.ne.s32.totalorder %s588_s1, %s855_s13  ;;  %p861_p6 = scmp.lt.s32.totalorder %s855_s13, %s855_s13 }
  0x59   :  { %191 = vmatpush1.bf16.msra.mxu0 %v697_v10  ;;  %v746_v45 = vld [vmem:[#allocation9 + $0x28] sm:$0xff]   ;;  %v747_v46 = vld [vmem:[#allocation9 + $0x70] sm:$0xff]   ;;  %v749_v48 = vld [vmem:[#allocation9 + $0x78] sm:$0xff]  }
  0x5a   :  { %192 = vmatprep.subr.bf16.mxu0 %v698_v11  ;;  %v748_v47 = vld [vmem:[#allocation9 + $0x30] sm:$0xff]   ;;  %v750_v49 = vld [vmem:[#allocation9 + $0x38] sm:$0xff]   ;;  %p862_p7 = por %p861_p6, %p860_p5 }
  0x5b   :  { %330 = vmatpush1.bf16.msra.mxu1 %v722_v22 }
  0x5c   :  { %331 = vmatprep.subr.bf16.mxu1 %v723_v24  ;;  %p863_p8 = pnand %p862_p7, %p856_p4 }
  0x5d   :  { %193 = vmatpush1.bf16.msra.mxu0 %v700_v14 }
  0x5e   :  { %194 = vmatprep.subr.bf16.mxu0 %v701_v16 }
  0x5f   :  { %332 = vmatpush1.bf16.msra.mxu1 %v725_v25 }
  0x60   :  { %333 = vmatprep.subr.bf16.mxu1 %v726_v26 }
  0x61   :  { %195 = vmatpush1.bf16.msra.mxu0 %v703_v19 }
  0x62   :  { %196 = vmatprep.subr.bf16.mxu0 %v704_v20 }
  0x63   :  { %334 = vmatpush1.bf16.msra.mxu1 %v728_v28 }
  0x64   :  { %335 = vmatprep.subr.bf16.mxu1 %v729_v30 }
  0x65   :  { %197 = vmatpush1.bf16.msra.mxu0 %v706_v21 }
  0x66   :  { %198 = vmatprep.subr.bf16.mxu0 %v710_v23 }
  0x67   :  { %336 = vmatpush1.bf16.msra.mxu1 %v731_v31 }
  0x68   :  { %337 = vmatprep.subr.bf16.mxu1 %v732_v32 }
  0x69   :  { %199 = vmatpush1.bf16.msra.mxu0 %v712_v27 }
  0x6a   :  { %654 = vmatprep.subr.bf16.mxu0 %v735_v34 }
  0x6b   :  { %338 = vmatpush1.bf16.msra.mxu1 %v734_v33 }
  0x6c   :  { %217 = vmatmul.mubr.bf16.vlgmr.msra.gmra.mrb[0].mxu0 %v716_v29 }
  0x6d   :  { %655 = vmatpush3.bf16.msra.mxu0 %v736_v35 }
  0x6e   :  { %356 = vmatmul.mubr.bf16.vlgmr.msra.gmra.mrb[0].mxu1 %v716_v29  ;;  %656 = vmatprep.subr.bf16.mxu0 %v737_v36 }
  0x71   :  { %657 = vmatpush3.bf16.msra.mxu0 %v738_v37 }
  0x72   :  { %658 = vmatprep.subr.bf16.mxu0 %v739_v38 }
  0x75   :  { %659 = vmatpush3.bf16.msra.mxu0 %v740_v39 }
  0x76   :  { %660 = vmatprep.subr.bf16.mxu0 %v741_v40 }
  0x79   :  { %661 = vmatpush3.bf16.msra.mxu0 %v742_v41 }
  0x7a   :  { %662 = vmatprep.subr.bf16.mxu0 %v743_v42 }
  0x7d   :  { %663 = vmatpush3.bf16.msra.mxu0 %v744_v43 }
  0x7e   :  { %664 = vmatprep.subr.bf16.mxu0 %v745_v44 }
  0x81   :  { %665 = vmatpush3.bf16.msra.mxu0 %v746_v45 }
  0x82   :  { %666 = vmatprep.subr.bf16.mxu0 %v747_v46 }
  0x85   :  { %667 = vmatpush3.bf16.msra.mxu0 %v748_v47 }
  0x86   :  { %668 = vmatprep.subr.bf16.mxu0 %v749_v48 }
  0x89   :  { %669 = vmatpush3.bf16.msra.mxu0 %v750_v49 }
 0x13f   :  { %v218_v50 = vpop.f32.mrb[0].mxu0 }
 0x140   :  { %v634_v51 = vmul.f32 -1.442695, %v218_v50  ;;  %v220_v52 = vpop.f32.mrb[1].mxu0 }
 0x141   :  { %v635_v53 = vmul.f32 -1.442695, %v220_v52  ;;  %v222_v54 = vpop.f32.mrb[2].mxu0  ;;  %v357_v58 = vpop.f32.mrb[0].mxu1 }
 0x142   :  { %751 = vpow2.f32 %v634_v51  ;;  %v636_v55 = vmul.f32 -1.442695, %v222_v54  ;;  %v224_v56 = vpop.f32.mrb[3].mxu0  ;;  %v359_v59 = vpop.f32.mrb[1].mxu1 }
 0x143   :  { %753 = vpow2.f32 %v635_v53  ;;  %v637_v57 = vmul.f32 -1.442695, %v224_v56  ;;  %v361_v60 = vpop.f32.mrb[2].mxu1 }
 0x144   :  { %755 = vpow2.f32 %v636_v55  ;;  %v363_v62 = vpop.f32.mrb[3].mxu1 }
 0x145   :  { %757 = vpow2.f32 %v637_v57 }
 0x14c   :  { %v752_v61 = vpop.eup %751 }
 0x14d   :  { %v754_v63 = vpop.eup %753  ;;  %v378_v0 = vadd.f32 1.0, %v752_v61 }
 0x14e   :  { %v756_v1 = vpop.eup %755  ;;  %v379_v2 = vadd.f32 1.0, %v754_v63 }
 0x14f   :  { %v758_v3 = vpop.eup %757  ;;  %759 = vrcp.f32 %v378_v0  ;;  %v380_v4 = vadd.f32 1.0, %v756_v1 }
 0x150   :  { %761 = vrcp.f32 %v379_v2  ;;  %v381_v5 = vadd.f32 1.0, %v758_v3 }
 0x151   :  { %763 = vrcp.f32 %v380_v4 }
 0x152   :  { %765 = vrcp.f32 %v381_v5 }
 0x159   :  { %v760_v6 = vpop.eup %759 }
 0x15a   :  { %v762_v7 = vpop.eup %761  ;;  %v390_v8 = vmul.f32 %v760_v6, %v218_v50 }
 0x15b   :  { %v764_v9 = vpop.eup %763  ;;  %v391_v10 = vmul.f32 %v762_v7, %v220_v52 }
 0x15c   :  { %v766_v11 = vpop.eup %765  ;;  %v392_v12 = vmul.f32 %v764_v9, %v222_v54  ;;  %v394_v13 = vmul.f32 %v390_v8, %v357_v58 }
 0x15d   :  { %v393_v14 = vmul.f32 %v766_v11, %v224_v56  ;;  %v395_v15 = vmul.f32 %v391_v10, %v359_v59 }
 0x15e   :  { %v396_v16 = vmul.f32 %v392_v12, %v361_v60 }
 0x15f   :  { %v397_v17 = vmul.f32 %v393_v14, %v363_v62 }
 0x160   :  { %v400_v18 = vpack.c.bf16 %v396_v16, %v394_v13 }
 0x161   :  { %v401_v19 = vpack.c.bf16 %v397_v17, %v395_v15 }
 0x163   :  { %562 = vmatprep.mubr.bf16.mxu0 %v401_v19 }
 0x164   :  { %563 = vmatmul.mubr.bf16.vlgmr.msra.gmra.mrb[4].mxu0 %v400_v18 }
 0x237   :  { %v670_v20 = vpop.f32.mrb[4].mxu0 }
 0x238   :  { %v671_v21 = vpop.f32.mrb[5].mxu0 }
 0x239   :  { %v672_v22 = vadd.f32 %v671_v21, %v670_v20  ;;  %v673_v23 = vpop.f32.mrb[6].mxu0 }
 0x23a   :  { %v674_v24 = vpop.f32.mrb[7].mxu0 }
 0x23b   :  { %580 = vst [vmem:[#allocation11] sm:$0xff] %v672_v22  ;;  %v675_v25 = vadd.f32 %v674_v24, %v673_v23 }
 0x23d   :  { %581 = vst [vmem:[#allocation11 + $0x8] sm:$0xff] %v675_v25 }
 0x23e   :  { %866 = shalt.err (!%p863_p8)
}
 0x23f   :  { %s867_s17 = scalar_lea.hbm %s1006_s4, 256 }
 0x240   :  { %p868_p9 = scmp.ne.s32.totalorder %s1006_s4, %s867_s17  ;;  %p871_p10 = scmp.lt.u32.totalorder %s867_s17, %s1006_s4 }
 0x242   :  { %p873_p11 = pnand %p871_p10, %p868_p9 }
 0x244   :  { %876 = shalt.err (!%p873_p11)
}
 0x245   :  { %593 = dma.vmem_to_hbm [thread:$0]  %s588_s1, 256, %s1006_s4, [#allocation5], %s886_s25, %s886_s25, %s887_s26  }
 0x246   :  { %883 = dma.done.wait [#allocation5], 256  }
 0x247   :  { %884 = vsyncadd [#allocation5], 4294967040 }
 0x248   :  { %597 = vsyncpa [#allocation4], 1 }
 0x249   :  { %598 = vsyncpa [#allocation7], 1 }
 0x24a   :  { %599 = vsyncpa [#allocation10], 1 }
 0x24b   :  { %600 = vsyncpa [#allocation5], 1 }

</bundles_post_ra>
